<compile_context>
chip_gen: v7x
topology: tpu7x:2x2x1
jax: 0.10.0
libtpu: 0.0.40
codegen_flags: <defaults>
</compile_context>

<pallas_src>
import math

import jax
import jax.numpy as jnp
from jax.experimental import pallas as pl
from jax.experimental.pallas import tpu as pltpu


def _round_up(n, m):
    return ((n + m - 1) // m) * m


def _hedging_kernel(xt_ref, w1t_ref, b1_ref, w2_ref, sc_ref, o_ref):
    # xt_ref : (D, tm)   x tile, batch on the 128-lane axis (lane-dense DMA)
    # w1t_ref: (H, D)    fc1 weight, pre-transposed, resident in VMEM
    # b1_ref : (H, 1)    fc1 bias (sublane vector, broadcast over lanes)
    # w2_ref : (H, 1)    fc2 weight (sublane vector)
    # sc_ref : (2,)      SMEM scalars: [b2, risk_limit]
    # o_ref  : (1, tm)   lane-dense output row (unmasked vst)

    # fc1 on the MXU, f32 accumulation: (H, D) @ (D, tm) -> (H, tm)
    h = jnp.dot(w1t_ref[...], xt_ref[...], preferred_element_type=jnp.float32)
    h = jnp.maximum(h + b1_ref[...], 0.0)                        # bias + ReLU (VPU)

    # fc2 (output dim = 1) as a VPU multiply + XLU sublane reduce instead of a
    # second, nearly-empty MXU matmul.
    raw = jnp.sum(h * w2_ref[...], axis=0, keepdims=True) + sc_ref[0]   # (1, tm)

    # Risk-limited output: tanh on the EUP, scale on the VPU, lane-dense store.
    o_ref[...] = sc_ref[1] * jnp.tanh(raw)


def _xla_forward(x, w1, b1, w2, b2, risk_limit):
    h = jnp.maximum(x @ w1 + b1, 0.0)
    return risk_limit * jnp.tanh(h @ w2 + b2)


def constrained_hedging_forward(x, w1, b1, w2, b2, risk_limit, *,
                                max_block_b=16384, min_pallas_batch=4096,
                                use_bf16=False):
    """x: (B, D); w1: (D, H); b1: (1, H); w2: (H, 1); b2: (1, 1) -> (B, 1)."""
    B, D = x.shape
    H = w1.shape[1]

    # Small batches: kernel dispatch + layout plumbing dominate; the fused XLA
    # expression is as fast or faster with zero padding/transpose traffic.
    if B < min_pallas_batch:
        return _xla_forward(x.astype(jnp.float32), w1.astype(jnp.float32),
                            b1.astype(jnp.float32), w2.astype(jnp.float32),
                            b2.astype(jnp.float32), risk_limit)

    # --- Tiling: pad B only to a lane multiple; choose a tile that divides the
    # padded batch (no fat dead tail) and is capped at max_block_b rows.
    # Force >= 2 grid steps when possible so both v7x TensorCores get work.
    b_pad = _round_up(B, 128)
    n_lane_tiles = b_pad // 128
    min_grid = 2 if n_lane_tiles >= 2 else 1
    grid = max(min_grid, pl.cdiv(b_pad, max_block_b))
    tm = 128 * pl.cdiv(n_lane_tiles, grid)        # tile rows, multiple of 128
    b_pad = tm * grid                             # final padded batch (tail < grid*128)

    in_dtype = jnp.bfloat16 if use_bf16 else jnp.float32

    # Layout plumbing: single fused transpose+pad pass; allow_input_fusion lets
    # XLA fold it into the pallas_call operand rather than a separate HBM pass.
    xt = jnp.pad(x.astype(in_dtype).T, ((0, 0), (0, b_pad - B)))     # (D, b_pad)
    w1t = w1.astype(in_dtype).T                                       # (H, D)
    b1c = b1.reshape(H, 1).astype(jnp.float32)                        # (H, 1)
    w2c = w2.reshape(H, 1).astype(jnp.float32)                        # (H, 1)
    scalars = jnp.stack([jnp.asarray(b2, jnp.float32).reshape(()),
                         jnp.asarray(risk_limit, jnp.float32)])       # (2,) -> SMEM

    out = pl.pallas_call(
        _hedging_kernel,
        out_shape=jax.ShapeDtypeStruct((1, b_pad), jnp.float32),
        grid=(grid,),
        in_specs=[
            pl.BlockSpec((D, tm), lambda i: (0, i)),           # x tiles, double-buffered
            pl.BlockSpec((H, D), lambda i: (0, 0)),            # fc1 weight, resident
            pl.BlockSpec((H, 1), lambda i: (0, 0)),            # fc1 bias, resident
            pl.BlockSpec((H, 1), lambda i: (0, 0)),            # fc2 weight, resident
            pl.BlockSpec(memory_space=pltpu.MemorySpace.SMEM), # [b2, risk_limit]
        ],
        out_specs=pl.BlockSpec((1, tm), lambda i: (0, i)),     # lane-dense output slab
        compiler_params=pltpu.CompilerParams(
            dimension_semantics=("parallel",),                 # shard batch across TCs
            allow_input_fusion=[True, False, False, False, False],
        ),
    )(xt, w1t, b1c, w2c, scalars)

    return out[0, :B].reshape(B, 1)


def init_params(key, input_dim, hidden_dim):
    """Deterministic init mirroring PyTorch nn.Linear default (uniform +/- 1/sqrt(fan_in))."""
    k1, k2, k3, k4 = jax.random.split(key, 4)
    bound1 = 1.0 / math.sqrt(input_dim)
    bound2 = 1.0 / math.sqrt(hidden_dim)
    w1 = jax.random.uniform(k1, (input_dim, hidden_dim), jnp.float32, -bound1, bound1)
    b1 = jax.random.uniform(k2, (1, hidden_dim), jnp.float32, -bound1, bound1)
    w2 = jax.random.uniform(k3, (hidden_dim, 1), jnp.float32, -bound2, bound2)
    b2 = jax.random.uniform(k4, (1, 1), jnp.float32, -bound2, bound2)
    return w1, b1, w2, b2


if __name__ == "__main__":
    input_dim = 10
    hidden_dim = 20
    risk_limit = 0.5
    batch_size = 32

    key = jax.random.PRNGKey(0)
    kx, kp = jax.random.split(key)
    x = jax.random.normal(kx, (batch_size, input_dim), jnp.float32)
    w1, b1, w2, b2 = init_params(kp, input_dim, hidden_dim)

    # Force the Pallas path at this tiny demo batch (production callers keep the
    # default min_pallas_batch so small batches take the plain XLA path).
    out = constrained_hedging_forward(x, w1, b1, w2, b2, risk_limit,
                                      min_pallas_batch=0)
    out = jax.block_until_ready(out)

    ref = _xla_forward(x, w1, b1, w2, b2, risk_limit)
    assert out.shape == (batch_size, 1)
    assert jnp.allclose(out, ref, atol=1e-5), "mismatch vs reference (B=32)"

    # Also exercise the multi-tile path (grid=2, uneven tail padding).
    x2 = jax.random.normal(kx, (300, input_dim), jnp.float32)
    out2 = jax.block_until_ready(
        constrained_hedging_forward(x2, w1, b1, w2, b2, risk_limit,
                                    min_pallas_batch=0))
    ref2 = _xla_forward(x2, w1, b1, w2, b2, risk_limit)
    assert out2.shape == (300, 1)
    assert jnp.allclose(out2, ref2, atol=1e-5), "mismatch vs reference (B=300)"

    print("KERNEL_OK")
</pallas_src>

<mosaic_0001>
module attributes {stable_mosaic.version = 11 : i64} {
  func.func @_hedging_kernel(%arg0: i32, %arg1: memref<10x128xf32, #tpu.memory_space<vmem>>, %arg2: memref<20x10xf32, #tpu.memory_space<vmem>>, %arg3: memref<20x1xf32, #tpu.memory_space<vmem>>, %arg4: memref<20x1xf32, #tpu.memory_space<vmem>>, %arg5: memref<2xf32, #tpu.memory_space<smem>>, %arg6: memref<1x128xf32, #tpu.memory_space<vmem>>) attributes {dimension_semantics = [#tpu.dimension_semantics<parallel>], iteration_bounds = array<i64: 1>, scalar_prefetch = 0 : i64, scratch_operands = 0 : i64, tpu.core_type = #tpu.core_type<tc>, window_params = [{transform_indices = @transform_0, window_bounds = array<i64: 10, 128>}, {pipeline_mode = #tpu.pipeline_mode<synchronous>, transform_indices = @transform_1, window_bounds = array<i64: 20, 10>}, {pipeline_mode = #tpu.pipeline_mode<synchronous>, transform_indices = @transform_2, window_bounds = array<i64: 20, 1>}, {pipeline_mode = #tpu.pipeline_mode<synchronous>, transform_indices = @transform_3, window_bounds = array<i64: 20, 1>}, {transform_indices = @transform_4, window_bounds = array<i64: 2>}, {transform_indices = @transform_5, window_bounds = array<i64: 1, 128>}]} {
    %c0 = arith.constant 0 : index
    %c0_0 = arith.constant 0 : index
    %0 = vector.load %arg2[%c0, %c0_0] : memref<20x10xf32, #tpu.memory_space<vmem>>, vector<20x10xf32>
    %c0_1 = arith.constant 0 : index
    %c0_2 = arith.constant 0 : index
    %1 = vector.load %arg1[%c0_1, %c0_2] : memref<10x128xf32, #tpu.memory_space<vmem>>, vector<10x128xf32>
    %cst = arith.constant dense<0.000000e+00> : vector<20x128xf32>
    %2 = tpu.matmul %0, %1, %cst {dimension_numbers = #tpu.dot_dimension_numbers<[1], [0], [0], [1], [0, 0, 1, 1], [], []>} : vector<20x10xf32>, vector<10x128xf32>, vector<20x128xf32> -> vector<20x128xf32>
    %c0_3 = arith.constant 0 : index
    %c0_4 = arith.constant 0 : index
    %3 = vector.load %arg3[%c0_3, %c0_4] : memref<20x1xf32, #tpu.memory_space<vmem>>, vector<20x1xf32>
    %4 = vector.broadcast %3 : vector<20x1xf32> to vector<20x128xf32>
    %5 = arith.addf %2, %4 : vector<20x128xf32>
    %cst_5 = arith.constant 0.000000e+00 : f32
    %6 = vector.broadcast %cst_5 : f32 to vector<20x128xf32>
    %7 = arith.maximumf %5, %6 : vector<20x128xf32>
    %c0_6 = arith.constant 0 : index
    %c0_7 = arith.constant 0 : index
    %8 = vector.load %arg4[%c0_6, %c0_7] : memref<20x1xf32, #tpu.memory_space<vmem>>, vector<20x1xf32>
    %9 = vector.broadcast %8 : vector<20x1xf32> to vector<20x128xf32>
    %10 = arith.mulf %7, %9 : vector<20x128xf32>
    %cst_8 = arith.constant dense<0.000000e+00> : vector<128xf32>
    %11 = vector.multi_reduction <add>, %10, %cst_8 [0] : vector<20x128xf32> to vector<128xf32>
    %12 = vector.shape_cast %11 : vector<128xf32> to vector<1x128xf32>
    %c0_9 = arith.constant 0 : index
    %13 = memref.load %arg5[%c0_9] : memref<2xf32, #tpu.memory_space<smem>>
    %14 = vector.broadcast %13 : f32 to vector<1x128xf32>
    %15 = arith.addf %12, %14 : vector<1x128xf32>
    %c1 = arith.constant 1 : index
    %16 = memref.load %arg5[%c1] : memref<2xf32, #tpu.memory_space<smem>>
    %17 = math.tanh %15 : vector<1x128xf32>
    %18 = vector.broadcast %16 : f32 to vector<1x128xf32>
    %19 = arith.mulf %18, %17 : vector<1x128xf32>
    %c0_10 = arith.constant 0 : index
    %c0_11 = arith.constant 0 : index
    %20 = vector.load %arg6[%c0_10, %c0_11] : memref<1x128xf32, #tpu.memory_space<vmem>>, vector<1x128xf32>
    tpu.vector_store %arg6[%c0_10, %c0_11], %19 {strides = array<i32>} : memref<1x128xf32, #tpu.memory_space<vmem>>, vector<1x128xf32>,
    return
  }
  func.func @transform_0(%arg0: i32) -> (i32, i32) {
    %c0_i32 = arith.constant 0 : i32
    %c0_i32_0 = arith.constant 0 : i32
    return %c0_i32, %arg0 : i32, i32
  }
  func.func @transform_1(%arg0: i32) -> (i32, i32) {
    %c0_i32 = arith.constant 0 : i32
    %c0_i32_0 = arith.constant 0 : i32
    %c0_i32_1 = arith.constant 0 : i32
    return %c0_i32, %c0_i32_0 : i32, i32
  }
  func.func @transform_2(%arg0: i32) -> (i32, i32) {
    %c0_i32 = arith.constant 0 : i32
    %c0_i32_0 = arith.constant 0 : i32
    %c0_i32_1 = arith.constant 0 : i32
    return %c0_i32, %c0_i32_0 : i32, i32
  }
  func.func @transform_3(%arg0: i32) -> (i32, i32) {
    %c0_i32 = arith.constant 0 : i32
    %c0_i32_0 = arith.constant 0 : i32
    %c0_i32_1 = arith.constant 0 : i32
    return %c0_i32, %c0_i32_0 : i32, i32
  }
  func.func @transform_4(%arg0: i32) -> i32 {
    %c0_i32 = arith.constant 0 : i32
    %c0_i32_0 = arith.constant 0 : i32
    return %c0_i32 : i32
  }
  func.func @transform_5(%arg0: i32) -> (i32, i32) {
    %c0_i32 = arith.constant 0 : i32
    %c0_i32_0 = arith.constant 0 : i32
    return %c0_i32, %arg0 : i32, i32
  }
}

</mosaic_0001>

<bundles_post_ra>
// kernel: tpu_custom_call.1
= control target key start
LH: loop header
LB: loop body
LE: loop exit
PB: predicated region body
PF: predicated region fallthrough
CT: control target
= control target key end

     0   :  { %10 = vsyncpa [#allocation4], 0  ;;  %s374_s0 = inlined_call_operand.vmem [shape: f32[10,128], index: 0, kind: input, shape index: {}]   ;;  %s375_s1 = inlined_call_operand.vmem [shape: f32[20,10], index: 1, kind: input, shape index: {}]   ;;  %s376_s2 = inlined_call_operand.vmem [shape: f32[20,1], index: 2, kind: input, shape index: {}]   ;;  %s377_s3 = inlined_call_operand.vmem [shape: f32[20,1], index: 3, kind: input, shape index: {}]   ;;  %s378_s4 = inlined_call_operand.vmem [shape: f32[2], index: 4, kind: input, shape index: {}]   ;;  %s379_s5 = inlined_call_operand.hbm [shape: f32[1,128], index: 5, kind: output, shape index: {}]  }
   0x1   :  { %11 = vsyncpa [#allocation3], 0  ;;  %s26_s20 = sshll.u32 %s378_s4, 4  ;;  %s27_s20 = int_to_ptr.vmem [resolvable:$true] %s26_s20 }
   0x2   :  { %s248_s21 = scalar_lea.vmem %s27_s20, 16  ;;  %p253_p1 = scmp.lt.s32.totalorder %s27_s20, %s27_s20 }
   0x3   :  { %p249_p0 = scmp.ne.s32.totalorder %s27_s20, %s248_s21  ;;  %p254_p2 = scmp.lt.s32.totalorder %s248_s21, %s248_s21 }
   0x5   :  { %p255_p3 = por %p254_p2, %p253_p1 }
   0x7   :  { %p256_p4 = pnand %p255_p3, %p249_p0 }
   0x9   :  { %259 = shalt.err (!%p256_p4)
}
   0xa   :  { %s286_s22 = smov [#allocation2]  }
   0xb   :  { %29 = dma.vmem_to_smem %s27_s20, 16, %s286_s22, [#allocation4]  }
   0xc   :  { %282 = dma.done.wait [#allocation4], 16  }
   0xd   :  { %283 = vsyncadd [#allocation4], 4294967280 }
   0xe   :  { %33 = sfence }
   0xf   :  { %v37_v0 = vld [vmem:[%s374_s0] sm:$0xff]  ;;  %v38_v1 = vld [vmem:[%s374_s0 + $0x8] sm:$0x3]  ;;  %vm67_vm0 = vcmask 1041408   ;;  %v287_v2 = vmov 0.0|0.0   ;;  %vm288_vm1 = vmmov 1  }
  0x10   :  { %231 = vmatprep.subr.bf16.mxu0 %v287_v2  ;;  %235 = vmatprep.subr.bf16.mxu1 %v287_v2  ;;  %v232_v3 = vpack.c.bf16 %v38_v1, %v37_v0  ;;  %vm233_vm2 = vmpackc.low %vm67_vm0, %vm288_vm1  ;;  %vm289_vm3 = vmmov 0   ;;  %v290_v4 = vmov 0.0   ;;  %v39_v5 = vld [vmem:[%s376_s2] sm:$0xff]  ;;  %v41_v6 = vld [vmem:[%s376_s2 + $0x10] sm:$0xf]  ;;  %vm57_vm4 = vcmask 80896  }
  0x11   :  { %222 = vmatprep.mubr.msk.f32.mxu0 %vm289_vm3, %v290_v4  ;;  %225 = vmatprep.mubr.msk.f32.mxu1 %vm289_vm3, %v290_v4  ;;  %v34_v7 = vld [vmem:[%s375_s1] sm:$0xff]  ;;  %v35_v8 = vld [vmem:[%s375_s1 + $0x8] sm:$0xff]  ;;  %v291_v9 = vmov 0   ;;  %v36_v12 = vld [vmem:[%s375_s1 + $0x10] sm:$0xf]  ;;  %vm176_vm5 = vcmask 1043456  }
  0x12   :  { %234 = vmatpush3.bf16.msk.msra.mxu0 %vm233_vm2, %v232_v3  ;;  %236 = vmatpush3.bf16.msk.msra.mxu1 %vm233_vm2, %v232_v3  ;;  %v40_v10 = vld [vmem:[%s376_s2 + $0x8] sm:$0xff]  ;;  %v154_v11 = vld [vmem:[%s377_s3] sm:$0xff]  ;;  %v156_v14 = vld [vmem:[%s377_s3 + $0x10] sm:$0xf]  ;;  %s185_s1 = sld [smem:[#allocation2]]  ;;  %s212_s2 = sld [smem:[#allocation2 + $0x1]] }
  0x13   :  { %244 = vset.pattern.permute.xlu0 %v291_v9  ;;  %245 = vset.pattern.permute.xlu1 %v291_v9  ;;  %v155_v13 = vld [vmem:[%s377_s3 + $0x8] sm:$0xff]  ;;  %s292_s3 = smov [#allocation5]  }
  0x14   :  { %44 = vperm.xlu0 %244, %v39_v5   ;;  %54 = vperm.xlu1 %245, %v41_v6   ;;  %s199_s18 = sshll.u32 %s292_s3, 4  ;;  %s200_s18 = int_to_ptr.vmem [resolvable:$true] %s199_s18 }
  0x15   :  { %223 = vmatmul.mubr.msk.f32.vlgmr.msra.gmra.mrb[0].mxu0 %vm57_vm4, %v34_v7  ;;  %226 = vmatmul.mubr.msk.f32.vlgmr.msra.gmra.mrb[0].mxu1 %vm57_vm4, %v35_v8  ;;  %s260_s19 = scalar_lea.vmem %s200_s18, 16  ;;  %s264_s20 = scalar_lea.vmem %s200_s18, 32 }
  0x16   :  { %228 = vmatprep.mubr.msk.f32.mxu1 %vm289_vm3, %v290_v4  ;;  %p261_p5 = scmp.ne.s32.totalorder %s200_s18, %s260_s19  ;;  %p265_p6 = scmp.lt.s32.totalorder %s200_s18, %s200_s18 }
  0x17   :  { %p266_p7 = scmp.lt.s32.totalorder %s264_s20, %s260_s19 }
  0x18   :  { %49 = vperm.xlu0 %244, %v40_v10   ;;  %159 = vperm.xlu1 %245, %v154_v11   ;;  %v186_v44 = vstv %s185_s1  ;;  %v190_v47 = vstv %s212_s2 }
  0x19   :  { %229 = vmatmul.mubr.msk.f32.gmra.mrb[2].mxu1 %vm57_vm4, %v36_v12  ;;  %p267_p8 = por %p266_p7, %p265_p6 }
  0x1b   :  { %p268_p9 = pnand %p267_p8, %p261_p5 }
  0x1c   :  { %164 = vperm.xlu0 %244, %v155_v13   ;;  %169 = vperm.xlu1 %245, %v156_v14  }
  0x93   :  { %v45_v15 = vpop.permute.xlu0 %44  ;;  %v55_v16 = vpop.permute.xlu1 %54 }
  0x97   :  { %v50_v17 = vpop.permute.xlu0 %49  ;;  %v160_v24 = vpop.permute.xlu1 %159 }
  0x9b   :  { %v165_v27 = vpop.permute.xlu0 %164  ;;  %v170_v35 = vpop.permute.xlu1 %169 }
  0xe8   :  { %v137_v18 = vpop.f32.mrb[0].mxu0  ;;  %v142_v19 = vpop.f32.mrb[0].mxu1 }
  0xe9   :  { %v138_v20 = vadd.f32 %v137_v18, %v45_v15  ;;  %v143_v21 = vadd.f32 %v142_v19, %v50_v17  ;;  %v227_v22 = vpop.f32.mrb[1].mxu1  ;;  %v224_v23 = vpop.f32.mrb[1].mxu0 }
  0xeb   :  { %v151_v25 = vmax.f32 %v138_v20, 0.0  ;;  %v152_v26 = vmax.f32 %v143_v21, 0.0 }
  0xec   :  { %v147_v28 = vpop.f32.mrb[2].mxu1 }
  0xed   :  { %v172_v29 = vmul.f32 %v160_v24, %v151_v25  ;;  %v173_v30 = vmul.f32 %v165_v27, %v152_v26  ;;  %v148_v31 = vadd.f32 %v147_v28, %v55_v16  ;;  %v230_v32 = vpop.f32.mrb[3].mxu1 }
  0xef   :  { %v175_v33 = vadd.f32 %v173_v30, %v172_v29  ;;  %v153_v34 = vmax.f32 %v148_v31, 0.0 }
  0xf1   :  { %v174_v36 = vmul.f32 %v170_v35, %v153_v34 }
  0xf3   :  { %v177_v37 = vsel %vm176_vm5, %v174_v36, 0.0 }
  0xf4   :  { %v178_v38 = vadd.f32 %v177_v37, %v175_v33 }
  0xf6   :  { %v179_v39 = vrot.slane %v178_v38, 4 }
  0xf8   :  { %v180_v40 = vadd.f32 %v179_v39, %v178_v38 }
  0xfa   :  { %v181_v41 = vrot.slane %v180_v40, 2 }
  0xfc   :  { %v182_v42 = vadd.f32 %v181_v41, %v180_v40 }
  0xfe   :  { %v183_v43 = vrot.slane %v182_v42, 1 }
 0x100   :  { %v184_v45 = vadd.f32 %v183_v43, %v182_v42 }
 0x102   :  { %v187_v46 = vadd.f32 %v186_v44, %v184_v45 }
 0x104   :  { %246 = vtanh.f32 %v187_v46 }
 0x10e   :  { %v247_v48 = vpop.eup %246 }
 0x10f   :  { %v191_v49 = vmul.f32 %v247_v48, %v190_v47 }
 0x111   :  { %192 = vst [vmem:[#allocation5] sm:$0x1] %v191_v49 }
 0x112   :  { %271 = shalt.err (!%p268_p9)
}
 0x113   :  { %s272_s23 = scalar_lea.hbm %s379_s5, 16 }
 0x114   :  { %p273_p10 = scmp.ne.s32.totalorder %s379_s5, %s272_s23  ;;  %p276_p11 = scmp.lt.u32.totalorder %s272_s23, %s379_s5 }
 0x116   :  { %p278_p12 = pnand %p276_p11, %p273_p10 }
 0x118   :  { %281 = shalt.err (!%p278_p12)
}
 0x119   :  { %202 = dma.vmem_to_hbm [thread:$0]  %s200_s18, 16, %s379_s5, [#allocation3]  }
 0x11a   :  { %284 = dma.done.wait [#allocation3], 16  }
 0x11b   :  { %285 = vsyncadd [#allocation3], 4294967280 }
 0x11c   :  { %206 = vsyncpa [#allocation3], 1 }
 0x11d   :  { %207 = vsyncpa [#allocation4], 1 }

</bundles_post_ra>
